<compile_context>
chip_gen: v5e
topology: v5e:2x2
jax: 0.10.0
libtpu: 0.0.40
codegen_flags: <defaults>
</compile_context>

<pallas_src>
import jax
import jax.numpy as jnp
from jax.experimental import pallas as pl
from jax.experimental.pallas import tpu as pltpu

INPUT_DIM = 40
HIDDEN_DIM = 64
OUT_DIM = 128
GATE_LANES = 4 * HIDDEN_DIM          # 256 = 2 vregs (i | o | g | zero-pad)

_SMALL_B = 1024                      # below this, single-block (launch-bound) path
_MAX_TILE = 4096                     # rows; double-buffered x+out ~4.7 MiB
_MIN_TILE = 512                      # rows; amortizes ~0.35 us per grid step


def _audio_encoder_kernel(x_ref, wg_ref, bg_ref, wp_ref, bp_ref, out_ref):
    """Fused single-step LSTM (h0=c0=0, dead f gate dropped) + projection.

    x_ref : [Bt, 40]   bf16
    wg_ref: [40, 256]  bf16  packed gate weights, order (i, o, g, 0-pad)
    bg_ref: [1, 256]   f32   packed gate bias (b_ih + b_hh), same order
    wp_ref: [64, 128]  bf16  output_proj weight (pre-transposed)
    bp_ref: [1, 128]   f32   output_proj bias
    """
    H = HIDDEN_DIM
    x = x_ref[...]

    # One lane-dense MXU push for all gates: [Bt, 256], f32 accumulation.
    gates = jnp.dot(x, wg_ref[...],
                    preferred_element_type=jnp.float32) + bg_ref[...]

    sig = jax.nn.sigmoid(gates[:, :2 * H])          # lanes   0:128  (i | o), 1 vreg
    tnh = jnp.tanh(gates[:, 2 * H:])                # lanes 128:256  (g | pad), 1 vreg
    i = sig[:, :H]
    o = sig[:, H:]
    g = tnh[:, :H]

    # c1 = f*c0 + i*g with c0 == 0  ->  c1 = i*g (f gate eliminated exactly).
    c = i * g
    h = (o * jnp.tanh(c)).astype(wp_ref.dtype)      # [Bt, 64] == lstm_out[:, -1]

    # output_proj: Linear(hidden_dim, 128), f32 accumulation + f32 output.
    out_ref[...] = (jnp.dot(h, wp_ref[...],
                            preferred_element_type=jnp.float32) + bp_ref[...])


def init_params(key):
    """Deterministic synthetic parameters matching the nn.Module shapes."""
    ks = jax.random.split(key, 6)
    s = 0.1
    return {
        # nn.LSTM(40, 64) layer-0 parameters (PyTorch gate order: i, f, g, o)
        "w_ih": jax.random.normal(ks[0], (4 * HIDDEN_DIM, INPUT_DIM), jnp.float32) * s,
        "w_hh": jax.random.normal(ks[1], (4 * HIDDEN_DIM, HIDDEN_DIM), jnp.float32) * s,  # unused: h0 == 0
        "b_ih": jax.random.normal(ks[2], (4 * HIDDEN_DIM,), jnp.float32) * s,
        "b_hh": jax.random.normal(ks[3], (4 * HIDDEN_DIM,), jnp.float32) * s,
        # output_proj = nn.Linear(64, 128)
        "w_proj": jax.random.normal(ks[4], (OUT_DIM, HIDDEN_DIM), jnp.float32) * s,
        "b_proj": jax.random.normal(ks[5], (OUT_DIM,), jnp.float32) * s,
    }


def prepare_params(params):
    """One-time packing: transposes, bias folding, gate reorder, 256-lane pad,
    bf16 weight cast — all hoisted out of the forward path."""
    H = HIDDEN_DIM
    w = params["w_ih"].T                               # [40, 4H], gate order i, f, g, o
    b = params["b_ih"] + params["b_hh"]                # [4H]
    zpad_w = jnp.zeros((INPUT_DIM, H), jnp.float32)
    zpad_b = jnp.zeros((H,), jnp.float32)
    # Drop the dead f gate; order (i, o, g, 0) so sigmoid lanes are one
    # contiguous [Bt, 128] vreg and tanh lanes are the second full vreg.
    w_gates = jnp.concatenate(
        [w[:, 0 * H:1 * H], w[:, 3 * H:4 * H], w[:, 2 * H:3 * H], zpad_w], axis=1)  # [40, 256]
    b_gates = jnp.concatenate(
        [b[0 * H:1 * H], b[3 * H:4 * H], b[2 * H:3 * H], zpad_b])[None, :]           # [1, 256]
    return {
        "w_gates": jax.device_put(w_gates.astype(jnp.bfloat16)),        # [40, 256] bf16
        "b_gates": jax.device_put(b_gates),                             # [1, 256]  f32
        "w_proj_t": jax.device_put(params["w_proj"].T.astype(jnp.bfloat16)),  # [64, 128] bf16
        "b_proj": jax.device_put(params["b_proj"][None, :]),            # [1, 128]  f32
    }


def _round_up(n, m):
    return ((n + m - 1) // m) * m


def _choose_tile(b):
    """>=4 grid steps for realistic B (keeps both v7x TensorCores busy),
    >=512 rows per step (amortize fixed per-step cost), <=4096 rows (VMEM)."""
    t = _round_up(max(1, -(-b // 4)), _MIN_TILE)
    return max(_MIN_TILE, min(_MAX_TILE, t))


def _cost(b_rows):
    return pl.CostEstimate(
        flops=2 * b_rows * (INPUT_DIM * GATE_LANES + HIDDEN_DIM * OUT_DIM),
        transcendentals=b_rows * (2 * HIDDEN_DIM + 2 * HIDDEN_DIM + HIDDEN_DIM),
        bytes_accessed=(2 * b_rows * INPUT_DIM                 # x (bf16)
                        + 2 * (INPUT_DIM * GATE_LANES + HIDDEN_DIM * OUT_DIM)  # weights (bf16)
                        + 4 * (GATE_LANES + OUT_DIM)           # biases (f32)
                        + 4 * b_rows * OUT_DIM),               # out (f32)
    )


def audio_encoder_forward(x, prepared, op_idx=1):
    if op_idx != 1:
        # TODO(synk): op_idx 0 and 2 produce [B,32] / [B,40] features that are
        # shape-incompatible with output_proj=Linear(64,128) and raise in the
        # reference PyTorch module; only the LSTM path (op_idx=1) is valid.
        raise NotImplementedError("only op_idx=1 (LSTM path) is shape-consistent")

    B, T = x.shape
    assert T == INPUT_DIM, "LSTM path requires T == input_dim (=40)"

    x = x.astype(jnp.bfloat16)
    wg = prepared["w_gates"]
    bg = prepared["b_gates"]
    wp = prepared["w_proj_t"]
    bp = prepared["b_proj"]

    if B <= _SMALL_B:
        # Launch-overhead-dominated regime: single VMEM block, no grid.
        # (A fused XLA dot would be just as fast here; kept as a kernel so the
        #  same code path is exercised at any batch size.)
        vmem = pl.BlockSpec(memory_space=pltpu.MemorySpace.VMEM)
        return pl.pallas_call(
            _audio_encoder_kernel,
            out_shape=jax.ShapeDtypeStruct((B, OUT_DIM), jnp.float32),
            in_specs=[vmem] * 5,
            out_specs=vmem,
            cost_estimate=_cost(B),
        )(x, wg, bg, wp, bp)

    # Large-batch path: cdiv grid over padded rows; batch axis is "parallel"
    # so v7x shards it across its 2 TensorCores.
    tile = _choose_tile(B)
    b_pad = _round_up(B, tile)
    if b_pad != B:
        x = jnp.pad(x, ((0, b_pad - B), (0, 0)))
    grid = (b_pad // tile,)

    out = pl.pallas_call(
        _audio_encoder_kernel,
        out_shape=jax.ShapeDtypeStruct((b_pad, OUT_DIM), jnp.float32),
        grid=grid,
        in_specs=[
            pl.BlockSpec((tile, INPUT_DIM), lambda i: (i, 0)),
            pl.BlockSpec((INPUT_DIM, GATE_LANES), lambda i: (0, 0)),
            pl.BlockSpec((1, GATE_LANES), lambda i: (0, 0)),
            pl.BlockSpec((HIDDEN_DIM, OUT_DIM), lambda i: (0, 0)),
            pl.BlockSpec((1, OUT_DIM), lambda i: (0, 0)),
        ],
        out_specs=pl.BlockSpec((tile, OUT_DIM), lambda i: (i, 0)),
        compiler_params=pltpu.CompilerParams(
            dimension_semantics=("parallel",),
            vmem_limit_bytes=32 * 1024 * 1024,     # v5e default is only 16 MiB
        ),
        cost_estimate=_cost(b_pad),
    )(x, wg, bg, wp, bp)

    return out[:B] if b_pad != B else out


def _reference(x, params):
    """Pure-JAX f32 reference mirroring the PyTorch op_idx==1 forward."""
    H = HIDDEN_DIM
    gates = x @ params["w_ih"].T + params["b_ih"] + params["b_hh"]    # h0 == 0
    i = jax.nn.sigmoid(gates[:, 0 * H:1 * H])
    f = jax.nn.sigmoid(gates[:, 1 * H:2 * H])           # multiplies c0 == 0
    g = jnp.tanh(gates[:, 2 * H:3 * H])
    o = jax.nn.sigmoid(gates[:, 3 * H:4 * H])
    c = i * g
    h = o * jnp.tanh(c)
    return h @ params["w_proj"].T + params["b_proj"]


if __name__ == "__main__":
    key = jax.random.PRNGKey(0)
    pkey, xkey = jax.random.split(key)
    params = init_params(pkey)
    prepared = prepare_params(params)   # one-time packing, hoisted out of forward

    # Small-shape smoke test (single-block path).
    B = 2
    x = jax.random.normal(xkey, (B, INPUT_DIM), jnp.float32)          # [B, T] = [2, 40]
    out = jax.block_until_ready(audio_encoder_forward(x, prepared, op_idx=1))
    ref = _reference(x, params)
    assert out.shape == (B, OUT_DIM), out.shape
    # bf16 matmul inputs -> loosened tolerance vs the f32 reference.
    assert jnp.allclose(out, ref, atol=5e-2, rtol=5e-2), \
        float(jnp.max(jnp.abs(out - ref)))

    # Tiled path: non-multiple B exercises cdiv grid + row padding + slicing.
    Bb = 3000
    xb = jax.random.normal(jax.random.PRNGKey(1), (Bb, INPUT_DIM), jnp.float32)
    outb = jax.block_until_ready(audio_encoder_forward(xb, prepared, op_idx=1))
    refb = _reference(xb, params)
    assert outb.shape == (Bb, OUT_DIM), outb.shape
    assert jnp.allclose(outb, refb, atol=5e-2, rtol=5e-2), \
        float(jnp.max(jnp.abs(outb - refb)))

    print("KERNEL_OK")
</pallas_src>

<mosaic_0001>
module attributes {stable_mosaic.version = 11 : i64} {
  func.func @_audio_encoder_kernel(%arg0: memref<2x40xbf16, #tpu.memory_space<vmem>>, %arg1: memref<40x256xbf16, #tpu.memory_space<vmem>>, %arg2: memref<1x256xf32, #tpu.memory_space<vmem>>, %arg3: memref<64x128xbf16, #tpu.memory_space<vmem>>, %arg4: memref<1x128xf32, #tpu.memory_space<vmem>>, %arg5: memref<2x128xf32, #tpu.memory_space<vmem>>) attributes {dimension_semantics = [], scalar_prefetch = 0 : i64, scratch_operands = 0 : i64, tpu.core_type = #tpu.core_type<tc>} {
    %c0 = arith.constant 0 : index
    %c0_0 = arith.constant 0 : index
    %0 = vector.load %arg0[%c0, %c0_0] : memref<2x40xbf16, #tpu.memory_space<vmem>>, vector<2x40xbf16>
    %c0_1 = arith.constant 0 : index
    %c0_2 = arith.constant 0 : index
    %1 = vector.load %arg1[%c0_1, %c0_2] : memref<40x256xbf16, #tpu.memory_space<vmem>>, vector<40x256xbf16>
    %cst = arith.constant dense<0.000000e+00> : vector<2x256xf32>
    %2 = tpu.matmul %0, %1, %cst {dimension_numbers = #tpu.dot_dimension_numbers<[1], [0], [0], [1], [0, 0, 1, 1], [], []>} : vector<2x40xbf16>, vector<40x256xbf16>, vector<2x256xf32> -> vector<2x256xf32>
    %c0_3 = arith.constant 0 : index
    %c0_4 = arith.constant 0 : index
    %3 = vector.load %arg2[%c0_3, %c0_4] : memref<1x256xf32, #tpu.memory_space<vmem>>, vector<1x256xf32>
    %4 = vector.broadcast %3 : vector<1x256xf32> to vector<2x256xf32>
    %5 = arith.addf %2, %4 : vector<2x256xf32>
    %6 = vector.extract_strided_slice %5 {offsets = [0, 0], sizes = [2, 128], strides = [1, 1]} : vector<2x256xf32> to vector<2x128xf32>
    %7 = arith.negf %6 : vector<2x128xf32>
    %8 = math.exp %7 : vector<2x128xf32>
    %cst_5 = arith.constant 1.000000e+00 : f32
    %9 = vector.broadcast %cst_5 : f32 to vector<2x128xf32>
    %10 = arith.addf %9, %8 : vector<2x128xf32>
    %11 = arith.divf %9, %10 : vector<2x128xf32>
    %12 = vector.extract_strided_slice %5 {offsets = [0, 128], sizes = [2, 128], strides = [1, 1]} : vector<2x256xf32> to vector<2x128xf32>
    %13 = math.tanh %12 : vector<2x128xf32>
    %14 = vector.extract_strided_slice %11 {offsets = [0, 0], sizes = [2, 64], strides = [1, 1]} : vector<2x128xf32> to vector<2x64xf32>
    %15 = vector.extract_strided_slice %11 {offsets = [0, 64], sizes = [2, 64], strides = [1, 1]} : vector<2x128xf32> to vector<2x64xf32>
    %16 = vector.extract_strided_slice %13 {offsets = [0, 0], sizes = [2, 64], strides = [1, 1]} : vector<2x128xf32> to vector<2x64xf32>
    %17 = arith.mulf %14, %16 : vector<2x64xf32>
    %18 = math.tanh %17 : vector<2x64xf32>
    %19 = arith.mulf %15, %18 : vector<2x64xf32>
    %20 = arith.truncf %19 : vector<2x64xf32> to vector<2x64xbf16>
    %c0_6 = arith.constant 0 : index
    %c0_7 = arith.constant 0 : index
    %21 = vector.load %arg3[%c0_6, %c0_7] : memref<64x128xbf16, #tpu.memory_space<vmem>>, vector<64x128xbf16>
    %cst_8 = arith.constant dense<0.000000e+00> : vector<2x128xf32>
    %22 = tpu.matmul %20, %21, %cst_8 {dimension_numbers = #tpu.dot_dimension_numbers<[1], [0], [0], [1], [0, 0, 1, 1], [], []>} : vector<2x64xbf16>, vector<64x128xbf16>, vector<2x128xf32> -> vector<2x128xf32>
    %c0_9 = arith.constant 0 : index
    %c0_10 = arith.constant 0 : index
    %23 = vector.load %arg4[%c0_9, %c0_10] : memref<1x128xf32, #tpu.memory_space<vmem>>, vector<1x128xf32>
    %24 = vector.broadcast %23 : vector<1x128xf32> to vector<2x128xf32>
    %25 = arith.addf %22, %24 : vector<2x128xf32>
    %c0_11 = arith.constant 0 : index
    %c0_12 = arith.constant 0 : index
    %26 = vector.load %arg5[%c0_11, %c0_12] : memref<2x128xf32, #tpu.memory_space<vmem>>, vector<2x128xf32>
    tpu.vector_store %arg5[%c0_11, %c0_12], %25 {strides = array<i32>} : memref<2x128xf32, #tpu.memory_space<vmem>>, vector<2x128xf32>,
    return
  }
}

</mosaic_0001>

<bundles_post_ra>
// kernel: tpu_custom_call.1
= control target key start
LH: loop header
LB: loop body
LE: loop exit
PB: predicated region body
PF: predicated region fallthrough
CT: control target
= control target key end

     0   :  { %10 = vsyncpa [#allocation3], 0  ;;  %s510_s0 = inlined_call_operand.hbm [shape: bf16[2,40], index: 0, kind: input, shape index: {}]   ;;  %s511_s1 = inlined_call_operand.hbm [shape: bf16[40,256], index: 1, kind: input, shape index: {}]   ;;  %s512_s2 = inlined_call_operand.hbm [shape: f32[1,256], index: 2, kind: input, shape index: {}]   ;;  %s513_s3 = inlined_call_operand.hbm [shape: bf16[64,128], index: 3, kind: input, shape index: {}]   ;;  %s514_s4 = inlined_call_operand.vmem [shape: f32[1,128], index: 4, kind: input, shape index: {}]   ;;  %s515_s5 = inlined_call_operand.hbm [shape: f32[2,128], index: 5, kind: output, shape index: {}]  }
   0x1   :  { %11 = vsyncpa [#allocation6], 0 }
   0x2   :  { %12 = vsyncpa [#allocation9], 0  ;;  %s29_s20 = sshll.u32 %s511_s1, 4  ;;  %s30_s20 = int_to_ptr.hbm [resolvable:$true] %s29_s20 }
   0x3   :  { %13 = vsyncpa [#allocation4], 0  ;;  %s449_s21 = smov [#allocation5]   ;;  %s19_s25 = sshll.u32 %s510_s0, 4  ;;  %s20_s25 = int_to_ptr.hbm [resolvable:$true] %s19_s25 }
   0x4   :  { %s31_s22 = sshll.u32 %s449_s21, 4  ;;  %s450_s26 = smov 128   ;;  %s32_s22 = int_to_ptr.vmem [resolvable:$true] %s31_s22 }
   0x5   :  { %s451_s27 = smov 8   ;;  %s452_s28 = smov [#allocation2]  }
   0x6   :  { %37 = dma.hbm_to_vmem [thread:$0]  %s30_s20, 640, %s32_s22, [#allocation6], %s450_s26, %s450_s26, %s451_s27  }
   0x7   :  { %s21_s29 = sshll.u32 %s452_s28, 4  ;;  %s43_s7 = sshll.u32 %s512_s2, 4  ;;  %s22_s29 = int_to_ptr.vmem [resolvable:$true] %s21_s29  ;;  %s44_s7 = int_to_ptr.hbm [resolvable:$true] %s43_s7 }
   0x8   :  { %24 = dma.hbm_to_vmem [thread:$0]  %s20_s25, 16, %s22_s29, [#allocation3]  }
   0x9   :  { %s53_s9 = sshll.u32 %s513_s3, 4  ;;  %s453_s10 = smov [#allocation7]   ;;  %s54_s9 = int_to_ptr.hbm [resolvable:$true] %s53_s9 }
   0xa   :  { %s45_s11 = sshll.u32 %s453_s10, 4  ;;  %s454_s0 = smov [#allocation8]   ;;  %s46_s11 = int_to_ptr.vmem [resolvable:$true] %s45_s11 }
   0xb   :  { %48 = dma.hbm_to_vmem [thread:$0]  %s44_s7, 32, %s46_s11, [#allocation6]  }
   0xc   :  { %s55_s12 = sshll.u32 %s454_s0, 4  ;;  %s455_s13 = smov 64   ;;  %s56_s12 = int_to_ptr.vmem [resolvable:$true] %s55_s12 }
   0xd   :  { %s456_s14 = smov 4  }
   0xe   :  { %61 = dma.hbm_to_vmem [thread:$0]  %s54_s9, 512, %s56_s12, [#allocation9], %s455_s13, %s455_s13, %s456_s14  }
   0xf   :  { %441 = dma.done.wait [#allocation3], 16  }
  0x10   :  { %442 = vsyncadd [#allocation3], 4294967280 }
  0x11   :  { %443 = dma.done.wait [#allocation6], 672  }
  0x12   :  { %444 = vsyncadd [#allocation6], 4294966624 }
  0x13   :  { %445 = dma.done.wait [#allocation9], 512  }
  0x14   :  { %446 = vsyncadd [#allocation9], 4294966784  ;;  %v86_v0 = vld [vmem:[#allocation5 + $0x20] sm:$0xff]  ;;  %vm122_vm0 = vcmask 1043456   ;;  %v269_v3 = vld [vmem:[#allocation5 + $0x10] sm:$0xf] }
  0x15   :  { %v106_v1 = vunpack.c.l.b16 %v86_v0  ;;  %v107_v2 = vunpack.c.h.b16 %v86_v0  ;;  %v298_v4 = vld [vmem:[#allocation5 + $0x14] sm:$0xf0]  ;;  %v297_v7 = vld [vmem:[#allocation5 + $0x14] sm:$0xf]  ;;  %v271_v8 = vld [vmem:[#allocation5 + $0x18] sm:$0xf0] }
  0x16   :  { %v270_v11 = vor.u32 %v298_v4, %v269_v3  ;;  %v261_v12 = vld [vmem:[#allocation5] sm:$0xf]  ;;  %v274_v13 = vor.u32 %v297_v7, %v271_v8  ;;  %v296_v14 = vld [vmem:[#allocation5 + $0x4] sm:$0xf0]  ;;  %v295_v15 = vld [vmem:[#allocation5 + $0x4] sm:$0xf] }
  0x17   :  { %v112_v5 = vpack.c.b16 %v106_v1, %v106_v1  ;;  %v113_v6 = vpack.c.b16 %v107_v2, %v107_v2  ;;  %v263_v16 = vld [vmem:[#allocation5 + $0x8] sm:$0xf0]  ;;  %v262_v17 = vor.u32 %v296_v14, %v261_v12  ;;  %v81_v19 = vld [vmem:[#allocation2] sm:$0x1]  ;;  %vm118_vm1 = vcmask 326656   ;;  %v302_v45 = vld [vmem:[#allocation8 + $0x18] sm:$0xff] }
  0x18   :  { %v266_v18 = vor.u32 %v295_v15, %v263_v16  ;;  %v87_v20 = vld [vmem:[#allocation7] sm:$0x3]  ;;  %230 = vmatpush.bf16.msra.mxu2 %v302_v45  ;;  %v301_v46 = vld [vmem:[#allocation8 + $0x10] sm:$0xff]  ;;  %v300_v47 = vld [vmem:[#allocation8 + $0x8] sm:$0xff]  ;;  %vm222_vm6 = vcmask 523264   ;;  %s457_s15 = smov [#allocation10]  }
  0x19   :  { %v124_v9 = vsel %vm122_vm0, %v112_v5, 0  ;;  %v127_v10 = vsel %vm122_vm0, %v113_v6, 0  ;;  %v89_v21 = vperm.slane %v87_v20, 0  ;;  %v90_v30 = vperm.slane %v87_v20, 1  ;;  %v299_v48 = vld [vmem:[#allocation8] sm:$0xff]  ;;  %s245_s16 = sshll.u32 %s457_s15, 4  ;;  %s246_s16 = int_to_ptr.vmem [resolvable:$true] %s245_s16 }
  0x1a   :  { %134 = vmatpush.bf16.msra.mxu0 %v124_v9  ;;  %147 = vmatpush.bf16.msra.mxu1 %v127_v10  ;;  %v312_v53 = vld [vmem:[%s514_s4] ss:$0 sm:$0xff]  ;;  %s247_s19 = sshll.u32 %s515_s5, 4  ;;  %s248_s19 = int_to_ptr.hbm [resolvable:$true] %s247_s19 }
  0x1c   :  { %231 = vmatpush.bf16.msra.mxu2 %v301_v46 }
  0x1e   :  { %135 = vmatpush.bf16.msra.mxu0 %v270_v11  ;;  %148 = vmatpush.bf16.msra.mxu1 %v274_v13 }
  0x20   :  { %232 = vmatpush.bf16.msra.mxu2 %v300_v47 }
  0x22   :  { %136 = vmatpush.bf16.msra.mxu0 %v262_v17  ;;  %149 = vmatpush.bf16.msra.mxu1 %v266_v18 }
  0x24   :  { %233 = vmatpush.bf16.msra.mxu2 %v299_v48 }
  0x25   :  { %275 = vmatmul.msk.bf16.vlgmr.msra.gmra.mxu0 %vm118_vm1, %v81_v19  ;;  %276 = vmatmul.msk.bf16.vlgmr.msra.gmra.mxu1 %vm118_vm1, %v81_v19 }
  0xa2   :  { %v138_v22 = vpop.f32.mrf.mxu0  ;;  %v151_v23 = vpop.f32.mrf.mxu1 }
  0xa3   :  { %v139_v24 = vadd.f32 %v138_v22, %v89_v21  ;;  %v152_v31 = vadd.f32 %v151_v23, %v90_v30 }
  0xa5   :  { %v277_v25 = vmul.f32 -1.442695, %v139_v24 }
  0xa7   :  { %313 = vpow2.f32 %v277_v25 }
  0xaa   :  { %v140_v26 = vpop.f32.mrf.mxu0  ;;  %v153_v27 = vpop.f32.mrf.mxu1 }
  0xad   :  { %v314_v28 = vpop.eup %313 }
  0xae   :  { %v158_v29 = vadd.f32 1.0, %v314_v28 }
  0xb0   :  { %315 = vrcp.f32 %v158_v29  ;;  %v170_v35 = vand.u32 2147483648, %v158_v29  ;;  %v168_v37 = vand.u32 2147483647, %v158_v29  ;;  %vm164_vm3 = vweird.f32 %v158_v29 }
  0xb1   :  { %317 = vtanh.f32 %v152_v31 }
  0xb2   :  { %v171_v40 = vor.u32 1.1754944e-38, %v170_v35  ;;  %vm169_vm5 = vcmp.eq.f32.partialorder %v168_v37, 8.507059e+37 }
  0xb6   :  { %v316_v32 = vpop.eup %315 }
  0xb7   :  { %v160_v33 = vmul.f32 %v316_v32, %v158_v29  ;;  %vm165_vm2 = vweird.f32 %v316_v32  ;;  %v318_v39 = vpop.eup %317 }
  0xb8   :  { %vm166_vm4 = vmor %vm164_vm3, %vm165_vm2 }
  0xb9   :  { %v161_v34 = vsub.f32 1.0, %v160_v33 }
  0xbb   :  { %v162_v36 = vmul.f32 %v316_v32, %v161_v34 }
  0xbd   :  { %v163_v38 = vadd.f32 %v316_v32, %v162_v36 }
  0xbf   :  { %v167_v41 = vsel %vm166_vm4, %v316_v32, %v163_v38 }
  0xc0   :  { %v172_v42 = vsel %vm169_vm5, %v171_v40, %v167_v41 }
  0xc1   :  { %v175_v43 = vmul.f32 %v318_v39, %v172_v42 }
  0xc3   :  { %319 = vtanh.f32 %v175_v43 }
  0xc9   :  { %v320_v44 = vpop.eup %319 }
  0xca   :  { %178 = vrot.lane.b32.xlu0 %v320_v44, %s455_s13 }
 0x13c   :  { %v179_v49 = vpop.permute.xlu0 %178 }
 0x13d   :  { %v181_v50 = vmul.f32 %v179_v49, %v172_v42 }
 0x13f   :  { %v182_v51 = vpack.c.bf16 %v181_v50, %v181_v50 }
 0x141   :  { %196 = vrot.lane.b32.xlu0 %v182_v51, %s455_s13 }
 0x1b3   :  { %v197_v52 = vpop.permute.xlu0 %196 }
 0x1b4   :  { %294 = vmatmul.msk.bf16.vlgmr.msra.gmra.mxu2 %vm222_vm6, %v197_v52 }
 0x237   :  { %v235_v54 = vpop.f32.mrf.mxu2 }
 0x238   :  { %v236_v55 = vadd.f32 %v312_v53, %v235_v54 }
 0x23a   :  { %239 = vst [vmem:[#allocation10] sm:$0x3] %v236_v55 }
 0x23b   :  { %250 = dma.vmem_to_hbm [thread:$0]  %s246_s16, 32, %s248_s19, [#allocation4]  }
 0x23f   :  { %v237_v56 = vpop.f32.mrf.mxu2 }
 0x240   :  { %447 = dma.done.wait [#allocation4], 32  }
 0x241   :  { %448 = vsyncadd [#allocation4], 4294967264 }
 0x242   :  { %255 = vsyncpa [#allocation3], 1 }
 0x243   :  { %256 = vsyncpa [#allocation6], 1 }
 0x244   :  { %257 = vsyncpa [#allocation9], 1 }
 0x245   :  { %258 = vsyncpa [#allocation4], 1 }

</bundles_post_ra>
